<compile_context>
chip_gen: v5e
topology: v5e:2x2
jax: 0.10.0
libtpu: 0.0.40
codegen_flags: <defaults>
</compile_context>

<pallas_src>
import jax
import jax.numpy as jnp
import numpy as np
from jax import lax
from jax.experimental import pallas as pl
from jax.experimental.pallas import tpu as pltpu


def td_shaper_kernel(x_ref, feat_ref, w1f_ref, w1t_ref, w2_ref, vec_ref, pool_ref, y_ref):
    btile, nf, fs = x_ref.shape
    rows = btile * nf

    # Fold the batch tile into the sublane (row) axis: (btile, nf, .) -> (btile*nf, .).
    x = x_ref[...].reshape(rows, fs)                               # f32
    feat = feat_ref[...].reshape(rows, feat_ref.shape[2])          # f32

    # ---- envelope transform: avg-pool(|x|) as a bf16 matmul, then log & center (f32) ----
    pooled = jnp.dot(jnp.abs(x).astype(jnp.bfloat16), pool_ref[...],
                     preferred_element_type=jnp.float32)           # (rows, env_len)
    logp = jnp.log(pooled + 0.5 ** 16)
    avg = jnp.mean(logp, axis=-1, keepdims=True)                   # (rows, 1)
    cen = (logp - avg).astype(jnp.bfloat16)                        # centered part of tenv
    feat_bf = feat.astype(jnp.bfloat16)

    # Causal "previous frame" mask. With batch folding, the sublane roll must not leak frames
    # across batch elements, so zero every row with (row % nf) == 0 (frame 0 of each element).
    keep = ((lax.broadcasted_iota(jnp.int32, (rows, 1), 0) % nf) > 0).astype(jnp.float32)

    # ---- stage 1: kernel-size-2 causal convs over features and tenv (biases fused) ----
    # Previous-tap term is computed unshifted, then rolled down one frame and masked
    # (roll commutes with the row-wise matmul); the env "avg" channel is a rank-1 term.
    cur1 = (jnp.dot(feat_bf, w1f_ref[0], preferred_element_type=jnp.float32)
            + jnp.dot(cen, w1t_ref[0], preferred_element_type=jnp.float32)
            + avg * vec_ref[0:1, :])
    prev1 = (jnp.dot(feat_bf, w1f_ref[1], preferred_element_type=jnp.float32)
             + jnp.dot(cen, w1t_ref[1], preferred_element_type=jnp.float32)
             + avg * vec_ref[1:2, :])
    a1 = cur1 + pltpu.roll(prev1, shift=1, axis=0) * keep + vec_ref[2:3, :]
    a1 = jnp.maximum(a1, 0.2 * a1)                                 # leaky_relu(0.2)

    # ---- stage 2: kernel-size-2 causal conv, kept in f32 (its output feeds exp()) ----
    cur2 = jnp.dot(a1, w2_ref[0], preferred_element_type=jnp.float32,
                   precision=lax.Precision.HIGHEST)
    prev2 = jnp.dot(a1, w2_ref[1], preferred_element_type=jnp.float32,
                    precision=lax.Precision.HIGHEST)
    a2 = cur2 + pltpu.roll(prev2, shift=1, axis=0) * keep + vec_ref[3:4, :]

    # ---- y = exp(alpha) * x   (interpolate_k == 1, no noise substitution) ----
    # TODO(synk): interpolate_k != 1 (nearest upsample + reflect-pad smoothing conv) and
    #             noise_substitution (scipy firwin highpass on noise) paths not implemented.
    # TODO(synk): lane-dense output (pack 4 frames per row with block-diagonal weights) only if
    #             a trace shows the masked 32-lane output stores dominating after batch folding.
    y = jnp.exp(a2) * x
    y_ref[...] = y.reshape(btile, nf, fs).astype(y_ref.dtype)


def _pick_batch_tile(batch, num_frames, target_rows=256):
    """Largest divisor of `batch` giving ~target_rows folded rows per grid step, while keeping
    >= 2 grid steps whenever batch >= 2 (so v7x's two TensorCores both get a tile)."""
    want = max(1, target_rows // max(num_frames, 1))
    cap = want if batch < 2 else max(1, min(want, batch // 2))
    bt = 1
    for d in range(1, batch + 1):
        if batch % d == 0 and d <= cap:
            bt = d
    return bt


def td_shaper_forward(x, features, params, *, frame_size, avg_pool_k):
    B, _, N = x.shape
    nf = features.shape[1]
    feature_dim = features.shape[2]
    env_len = frame_size // avg_pool_k       # env_dim - 1
    assert N == nf * frame_size

    wf = params["wf"]                        # (hidden, feature_dim, 2)
    wt = params["wt"]                        # (hidden, env_dim, 2)
    w2 = params["w2"]                        # (hidden, hidden, 2)
    bias1 = params["bf"] + params["bt"]      # stage-1 biases fold into one
    bias2 = params["b2"]

    # Conv tap 1 acts on the current frame, tap 0 on the previous (left-padded) frame.
    # Pack [cur, prev] weights on a leading axis -> few grid-invariant inputs, fetched once.
    w1f = jnp.stack([wf[:, :, 1].T, wf[:, :, 0].T]).astype(jnp.bfloat16)                 # (2, fd, h)
    w1t = jnp.stack([wt[:, :env_len, 1].T, wt[:, :env_len, 0].T]).astype(jnp.bfloat16)   # (2, env_len, h)
    w2p = jnp.stack([w2[:, :, 1].T, w2[:, :, 0].T]).astype(jnp.float32)                  # (2, h, h)
    # Row layout: [avg-channel weight (cur), avg-channel weight (prev), bias1, bias2].
    vec = jnp.stack([wt[:, env_len, 1], wt[:, env_len, 0], bias1, bias2]).astype(jnp.float32)  # (4, h)

    # avg-pool of |x| as a matmul: (frame_size, env_len) block-diagonal with 1/k entries.
    rows = jnp.arange(frame_size)[:, None] // avg_pool_k
    cols = jnp.arange(env_len)[None, :]
    pool = ((rows == cols).astype(jnp.float32) / avg_pool_k).astype(jnp.bfloat16)

    x_frames = x.reshape(B, nf, frame_size)

    btile = _pick_batch_tile(B, nf)
    grid = (B // btile,)

    y_frames = pl.pallas_call(
        td_shaper_kernel,
        out_shape=jax.ShapeDtypeStruct((B, nf, frame_size), x.dtype),
        grid_spec=pltpu.PrefetchScalarGridSpec(
            num_scalar_prefetch=0,
            grid=grid,
            in_specs=[
                pl.BlockSpec((btile, nf, frame_size), lambda b: (b, 0, 0)),
                pl.BlockSpec((btile, nf, feature_dim), lambda b: (b, 0, 0)),
                pl.BlockSpec(w1f.shape, lambda b: (0, 0, 0)),
                pl.BlockSpec(w1t.shape, lambda b: (0, 0, 0)),
                pl.BlockSpec(w2p.shape, lambda b: (0, 0, 0)),
                pl.BlockSpec(vec.shape, lambda b: (0, 0)),
                pl.BlockSpec(pool.shape, lambda b: (0, 0)),
            ],
            out_specs=pl.BlockSpec((btile, nf, frame_size), lambda b: (b, 0, 0)),
        ),
        compiler_params=pltpu.CompilerParams(
            dimension_semantics=("parallel",)),
    )(x_frames, features, w1f, w1t, w2p, vec, pool)

    return y_frames.reshape(B, 1, N)


def td_shaper_reference(x, features, params, *, frame_size, avg_pool_k):
    """Pure-JAX (f32) re-implementation of the PyTorch forward (interpolate_k=1)."""
    B, _, N = x.shape
    k = avg_pool_k
    env_len = frame_size // k
    xa = jnp.abs(x)
    pooled = jnp.mean(xa.reshape(B, 1, N // k, k), axis=-1)
    logp = jnp.log(pooled + 0.5 ** 16)
    e = logp.reshape(B, -1, env_len)
    avg = jnp.mean(e, axis=-1, keepdims=True)
    tenv = jnp.concatenate([e - avg, avg], axis=-1)

    def causal_conv_k2(inp, w, b):   # inp: (B, nf, Cin), w: (Cout, Cin, 2)
        prev = jnp.concatenate([jnp.zeros_like(inp[:, :1]), inp[:, :-1]], axis=1)
        return (jnp.einsum('bnc,oc->bno', prev, w[:, :, 0])
                + jnp.einsum('bnc,oc->bno', inp, w[:, :, 1]) + b)

    a = (causal_conv_k2(features, params["wf"], params["bf"])
         + causal_conv_k2(tenv, params["wt"], params["bt"]))
    a = jnp.where(a > 0, a, 0.2 * a)
    a = causal_conv_k2(a, params["w2"], params["b2"])
    alpha = jnp.exp(a.reshape(B, 1, N))
    return alpha * x


if __name__ == "__main__":
    # Small, TDShaper-consistent shapes; B=4 exercises both the batch fold (Bt=2) and a
    # 2-step parallel grid.
    feature_dim = 32
    frame_size = 32
    avg_pool_k = 4
    B = 4
    num_frames = 8
    N = num_frames * frame_size
    hidden = frame_size                       # frame_size // interpolate_k
    env_dim = frame_size // avg_pool_k + 1

    key = jax.random.PRNGKey(0)
    k1, k2, k3, k4, k5, k6, k7, k8 = jax.random.split(key, 8)
    params = {
        "wf": 0.1 * jax.random.normal(k1, (hidden, feature_dim, 2), jnp.float32),
        "bf": 0.1 * jax.random.normal(k2, (hidden,), jnp.float32),
        "wt": 0.1 * jax.random.normal(k3, (hidden, env_dim, 2), jnp.float32),
        "bt": 0.1 * jax.random.normal(k4, (hidden,), jnp.float32),
        "w2": 0.1 * jax.random.normal(k5, (hidden, hidden, 2), jnp.float32),
        "b2": 0.1 * jax.random.normal(k6, (hidden,), jnp.float32),
    }
    x = jax.random.normal(k7, (B, 1, N), jnp.float32)
    features = jax.random.normal(k8, (B, num_frames, feature_dim), jnp.float32)

    y = td_shaper_forward(x, features, params,
                          frame_size=frame_size, avg_pool_k=avg_pool_k)
    jax.block_until_ready(y)

    y_ref = td_shaper_reference(x, features, params,
                                frame_size=frame_size, avg_pool_k=avg_pool_k)
    assert y.shape == (B, 1, N)
    # Tolerance sized for bf16 stage-1/pooling operands (f32 accumulation, f32 stage-2)
    # vs. the all-f32 reference.
    np.testing.assert_allclose(np.asarray(y), np.asarray(y_ref), rtol=2e-2, atol=2e-2)
    print("KERNEL_OK")
</pallas_src>

<mosaic_0001>
module attributes {stable_mosaic.version = 11 : i64} {
  func.func @td_shaper_kernel(%arg0: i32, %arg1: memref<2x8x32xf32, #tpu.memory_space<vmem>>, %arg2: memref<2x8x32xf32, #tpu.memory_space<vmem>>, %arg3: memref<2x32x32xbf16, #tpu.memory_space<vmem>>, %arg4: memref<2x8x32xbf16, #tpu.memory_space<vmem>>, %arg5: memref<2x32x32xf32, #tpu.memory_space<vmem>>, %arg6: memref<4x32xf32, #tpu.memory_space<vmem>>, %arg7: memref<32x8xbf16, #tpu.memory_space<vmem>>, %arg8: memref<2x8x32xf32, #tpu.memory_space<vmem>>) attributes {dimension_semantics = [#tpu.dimension_semantics<parallel>], iteration_bounds = array<i64: 2>, scalar_prefetch = 0 : i64, scratch_operands = 0 : i64, tpu.core_type = #tpu.core_type<tc>, window_params = [{transform_indices = @transform_0, window_bounds = array<i64: 2, 8, 32>}, {transform_indices = @transform_1, window_bounds = array<i64: 2, 8, 32>}, {pipeline_mode = #tpu.pipeline_mode<synchronous>, transform_indices = @transform_2, window_bounds = array<i64: 2, 32, 32>}, {pipeline_mode = #tpu.pipeline_mode<synchronous>, transform_indices = @transform_3, window_bounds = array<i64: 2, 8, 32>}, {pipeline_mode = #tpu.pipeline_mode<synchronous>, transform_indices = @transform_4, window_bounds = array<i64: 2, 32, 32>}, {pipeline_mode = #tpu.pipeline_mode<synchronous>, transform_indices = @transform_5, window_bounds = array<i64: 4, 32>}, {pipeline_mode = #tpu.pipeline_mode<synchronous>, transform_indices = @transform_6, window_bounds = array<i64: 32, 8>}, {transform_indices = @transform_7, window_bounds = array<i64: 2, 8, 32>}]} {
    %c0 = arith.constant 0 : index
    %c0_0 = arith.constant 0 : index
    %c0_1 = arith.constant 0 : index
    %0 = vector.load %arg1[%c0, %c0_0, %c0_1] : memref<2x8x32xf32, #tpu.memory_space<vmem>>, vector<2x8x32xf32>
    %1 = vector.shape_cast %0 : vector<2x8x32xf32> to vector<16x32xf32>
    %c0_2 = arith.constant 0 : index
    %c0_3 = arith.constant 0 : index
    %c0_4 = arith.constant 0 : index
    %2 = vector.load %arg2[%c0_2, %c0_3, %c0_4] : memref<2x8x32xf32, #tpu.memory_space<vmem>>, vector<2x8x32xf32>
    %3 = vector.shape_cast %2 : vector<2x8x32xf32> to vector<16x32xf32>
    %4 = math.absf %1 : vector<16x32xf32>
    %5 = arith.truncf %4 : vector<16x32xf32> to vector<16x32xbf16>
    %c0_5 = arith.constant 0 : index
    %c0_6 = arith.constant 0 : index
    %6 = vector.load %arg7[%c0_5, %c0_6] : memref<32x8xbf16, #tpu.memory_space<vmem>>, vector<32x8xbf16>
    %cst = arith.constant dense<0.000000e+00> : vector<16x8xf32>
    %7 = tpu.matmul %5, %6, %cst {dimension_numbers = #tpu.dot_dimension_numbers<[1], [0], [0], [1], [0, 0, 1, 1], [], []>} : vector<16x32xbf16>, vector<32x8xbf16>, vector<16x8xf32> -> vector<16x8xf32>
    %cst_7 = arith.constant 1.52587891E-5 : f32
    %8 = vector.broadcast %cst_7 : f32 to vector<16x8xf32>
    %9 = arith.addf %7, %8 : vector<16x8xf32>
    %10 = math.log %9 : vector<16x8xf32>
    %cst_8 = arith.constant dense<0.000000e+00> : vector<16xf32>
    %11 = vector.multi_reduction <add>, %10, %cst_8 [1] : vector<16x8xf32> to vector<16xf32>
    %12 = vector.shape_cast %11 : vector<16xf32> to vector<16x1xf32>
    %cst_9 = arith.constant 8.000000e+00 : f32
    %13 = vector.broadcast %cst_9 : f32 to vector<16x1xf32>
    %14 = arith.divf %12, %13 : vector<16x1xf32>
    %15 = vector.broadcast %14 : vector<16x1xf32> to vector<16x8xf32>
    %16 = arith.subf %10, %15 : vector<16x8xf32>
    %17 = arith.truncf %16 : vector<16x8xf32> to vector<16x8xbf16>
    %18 = arith.truncf %3 : vector<16x32xf32> to vector<16x32xbf16>
    %19 = tpu.iota {dimensions = array<i32: 0>} : vector<16x1xi32>
    %c8_i32 = arith.constant 8 : i32
    %c0_i32 = arith.constant 0 : i32
    %20 = arith.cmpi eq, %c8_i32, %c0_i32 : i32
    %c1_i32 = arith.constant 1 : i32
    %21 = arith.select %20, %c1_i32, %c8_i32 : i32
    %22 = vector.broadcast %21 : i32 to vector<16x1xi32>
    %23 = arith.remsi %19, %22 : vector<16x1xi32>
    %c0_i32_10 = arith.constant 0 : i32
    %24 = vector.broadcast %c0_i32_10 : i32 to vector<16x1xi32>
    %25 = arith.cmpi ne, %23, %24 : vector<16x1xi32>
    %c0_i32_11 = arith.constant 0 : i32
    %26 = vector.broadcast %c0_i32_11 : i32 to vector<16x1xi32>
    %27 = arith.cmpi slt, %23, %26 : vector<16x1xi32>
    %c0_i32_12 = arith.constant 0 : i32
    %28 = arith.cmpi slt, %21, %c0_i32_12 : i32
    %29 = vector.broadcast %28 : i1 to vector<16x1xi1>
    %30 = vector.broadcast %29 : vector<16x1xi1> to vector<16x1xi1>
    %31 = arith.xori %27, %30 : vector<16x1xi1>
    %32 = arith.andi %31, %25 : vector<16x1xi1>
    %33 = vector.broadcast %21 : i32 to vector<16x1xi32>
    %34 = arith.addi %23, %33 : vector<16x1xi32>
    %35 = arith.select %32, %34, %23 : vector<16x1xi1>, vector<16x1xi32>
    %c0_i32_13 = arith.constant 0 : i32
    %36 = vector.broadcast %c0_i32_13 : i32 to vector<16x1xi32>
    %37 = arith.cmpi sgt, %35, %36 : vector<16x1xi32>
    %38 = arith.extui %37 : vector<16x1xi1> to vector<16x1xi32>
    %39 = arith.sitofp %38 : vector<16x1xi32> to vector<16x1xf32>
    %c0_14 = arith.constant 0 : index
    %c0_15 = arith.constant 0 : index
    %c0_16 = arith.constant 0 : index
    %40 = vector.load %arg3[%c0_14, %c0_15, %c0_16] : memref<2x32x32xbf16, #tpu.memory_space<vmem>>, vector<1x32x32xbf16>
    %41 = vector.shape_cast %40 : vector<1x32x32xbf16> to vector<32x32xbf16>
    %cst_17 = arith.constant dense<0.000000e+00> : vector<16x32xf32>
    %42 = tpu.matmul %18, %41, %cst_17 {dimension_numbers = #tpu.dot_dimension_numbers<[1], [0], [0], [1], [0, 0, 1, 1], [], []>} : vector<16x32xbf16>, vector<32x32xbf16>, vector<16x32xf32> -> vector<16x32xf32>
    %c0_18 = arith.constant 0 : index
    %c0_19 = arith.constant 0 : index
    %c0_20 = arith.constant 0 : index
    %43 = vector.load %arg4[%c0_18, %c0_19, %c0_20] : memref<2x8x32xbf16, #tpu.memory_space<vmem>>, vector<1x8x32xbf16>
    %44 = vector.shape_cast %43 : vector<1x8x32xbf16> to vector<8x32xbf16>
    %cst_21 = arith.constant dense<0.000000e+00> : vector<16x32xf32>
    %45 = tpu.matmul %17, %44, %cst_21 {dimension_numbers = #tpu.dot_dimension_numbers<[1], [0], [0], [1], [0, 0, 1, 1], [], []>} : vector<16x8xbf16>, vector<8x32xbf16>, vector<16x32xf32> -> vector<16x32xf32>
    %46 = arith.addf %42, %45 : vector<16x32xf32>
    %c0_22 = arith.constant 0 : index
    %c0_23 = arith.constant 0 : index
    %47 = vector.load %arg6[%c0_22, %c0_23] : memref<4x32xf32, #tpu.memory_space<vmem>>, vector<1x32xf32>
    %48 = vector.broadcast %14 : vector<16x1xf32> to vector<16x32xf32>
    %49 = vector.broadcast %47 : vector<1x32xf32> to vector<16x32xf32>
    %50 = arith.mulf %48, %49 : vector<16x32xf32>
    %51 = arith.addf %46, %50 : vector<16x32xf32>
    %c1 = arith.constant 1 : index
    %c0_24 = arith.constant 0 : index
    %c0_25 = arith.constant 0 : index
    %52 = vector.load %arg3[%c1, %c0_24, %c0_25] : memref<2x32x32xbf16, #tpu.memory_space<vmem>>, vector<1x32x32xbf16>
    %53 = vector.shape_cast %52 : vector<1x32x32xbf16> to vector<32x32xbf16>
    %cst_26 = arith.constant dense<0.000000e+00> : vector<16x32xf32>
    %54 = tpu.matmul %18, %53, %cst_26 {dimension_numbers = #tpu.dot_dimension_numbers<[1], [0], [0], [1], [0, 0, 1, 1], [], []>} : vector<16x32xbf16>, vector<32x32xbf16>, vector<16x32xf32> -> vector<16x32xf32>
    %c1_27 = arith.constant 1 : index
    %c0_28 = arith.constant 0 : index
    %c0_29 = arith.constant 0 : index
    %55 = vector.load %arg4[%c1_27, %c0_28, %c0_29] : memref<2x8x32xbf16, #tpu.memory_space<vmem>>, vector<1x8x32xbf16>
    %56 = vector.shape_cast %55 : vector<1x8x32xbf16> to vector<8x32xbf16>
    %cst_30 = arith.constant dense<0.000000e+00> : vector<16x32xf32>
    %57 = tpu.matmul %17, %56, %cst_30 {dimension_numbers = #tpu.dot_dimension_numbers<[1], [0], [0], [1], [0, 0, 1, 1], [], []>} : vector<16x8xbf16>, vector<8x32xbf16>, vector<16x32xf32> -> vector<16x32xf32>
    %58 = arith.addf %54, %57 : vector<16x32xf32>
    %c1_31 = arith.constant 1 : index
    %c0_32 = arith.constant 0 : index
    %59 = vector.load %arg6[%c1_31, %c0_32] : memref<4x32xf32, #tpu.memory_space<vmem>>, vector<1x32xf32>
    %60 = vector.broadcast %14 : vector<16x1xf32> to vector<16x32xf32>
    %61 = vector.broadcast %59 : vector<1x32xf32> to vector<16x32xf32>
    %62 = arith.mulf %60, %61 : vector<16x32xf32>
    %63 = arith.addf %58, %62 : vector<16x32xf32>
    %c1_i32_33 = arith.constant 1 : i32
    %64 = tpu.dynamic_rotate %63 by %c1_i32_33 dim 0 : vector<16x32xf32>, i32 -> vector<16x32xf32>
    %65 = vector.broadcast %39 : vector<16x1xf32> to vector<16x32xf32>
    %66 = arith.mulf %64, %65 : vector<16x32xf32>
    %67 = arith.addf %51, %66 : vector<16x32xf32>
    %c2 = arith.constant 2 : index
    %c0_34 = arith.constant 0 : index
    %68 = vector.load %arg6[%c2, %c0_34] : memref<4x32xf32, #tpu.memory_space<vmem>>, vector<1x32xf32>
    %69 = vector.broadcast %68 : vector<1x32xf32> to vector<16x32xf32>
    %70 = arith.addf %67, %69 : vector<16x32xf32>
    %cst_35 = arith.constant 2.000000e-01 : f32
    %71 = vector.broadcast %cst_35 : f32 to vector<16x32xf32>
    %72 = arith.mulf %71, %70 : vector<16x32xf32>
    %73 = arith.maximumf %70, %72 : vector<16x32xf32>
    %c0_36 = arith.constant 0 : index
    %c0_37 = arith.constant 0 : index
    %c0_38 = arith.constant 0 : index
    %74 = vector.load %arg5[%c0_36, %c0_37, %c0_38] : memref<2x32x32xf32, #tpu.memory_space<vmem>>, vector<1x32x32xf32>
    %75 = vector.shape_cast %74 : vector<1x32x32xf32> to vector<32x32xf32>
    %cst_39 = arith.constant dense<0.000000e+00> : vector<16x32xf32>
    %76 = tpu.matmul %73, %75, %cst_39 {dimension_numbers = #tpu.dot_dimension_numbers<[1], [0], [0], [1], [0, 0, 1, 1], [], []>, precision = #tpu.contract_precision<fp32>} : vector<16x32xf32>, vector<32x32xf32>, vector<16x32xf32> -> vector<16x32xf32>
    %c1_40 = arith.constant 1 : index
    %c0_41 = arith.constant 0 : index
    %c0_42 = arith.constant 0 : index
    %77 = vector.load %arg5[%c1_40, %c0_41, %c0_42] : memref<2x32x32xf32, #tpu.memory_space<vmem>>, vector<1x32x32xf32>
    %78 = vector.shape_cast %77 : vector<1x32x32xf32> to vector<32x32xf32>
    %cst_43 = arith.constant dense<0.000000e+00> : vector<16x32xf32>
    %79 = tpu.matmul %73, %78, %cst_43 {dimension_numbers = #tpu.dot_dimension_numbers<[1], [0], [0], [1], [0, 0, 1, 1], [], []>, precision = #tpu.contract_precision<fp32>} : vector<16x32xf32>, vector<32x32xf32>, vector<16x32xf32> -> vector<16x32xf32>
    %c1_i32_44 = arith.constant 1 : i32
    %80 = tpu.dynamic_rotate %79 by %c1_i32_44 dim 0 : vector<16x32xf32>, i32 -> vector<16x32xf32>
    %81 = vector.broadcast %39 : vector<16x1xf32> to vector<16x32xf32>
    %82 = arith.mulf %80, %81 : vector<16x32xf32>
    %83 = arith.addf %76, %82 : vector<16x32xf32>
    %c3 = arith.constant 3 : index
    %c0_45 = arith.constant 0 : index
    %84 = vector.load %arg6[%c3, %c0_45] : memref<4x32xf32, #tpu.memory_space<vmem>>, vector<1x32xf32>
    %85 = vector.broadcast %84 : vector<1x32xf32> to vector<16x32xf32>
    %86 = arith.addf %83, %85 : vector<16x32xf32>
    %87 = math.exp %86 : vector<16x32xf32>
    %88 = arith.mulf %87, %1 : vector<16x32xf32>
    %89 = vector.shape_cast %88 : vector<16x32xf32> to vector<2x8x32xf32>
    %c0_46 = arith.constant 0 : index
    %c0_47 = arith.constant 0 : index
    %c0_48 = arith.constant 0 : index
    %90 = vector.load %arg8[%c0_46, %c0_47, %c0_48] : memref<2x8x32xf32, #tpu.memory_space<vmem>>, vector<2x8x32xf32>
    tpu.vector_store %arg8[%c0_46, %c0_47, %c0_48], %89 {strides = array<i32>} : memref<2x8x32xf32, #tpu.memory_space<vmem>>, vector<2x8x32xf32>,
    return
  }
  func.func @transform_0(%arg0: i32) -> (i32, i32, i32) {
    %c0_i32 = arith.constant 0 : i32
    %c0_i32_0 = arith.constant 0 : i32
    %c0_i32_1 = arith.constant 0 : i32
    return %arg0, %c0_i32, %c0_i32_0 : i32, i32, i32
  }
  func.func @transform_1(%arg0: i32) -> (i32, i32, i32) {
    %c0_i32 = arith.constant 0 : i32
    %c0_i32_0 = arith.constant 0 : i32
    %c0_i32_1 = arith.constant 0 : i32
    return %arg0, %c0_i32, %c0_i32_0 : i32, i32, i32
  }
  func.func @transform_2(%arg0: i32) -> (i32, i32, i32) {
    %c0_i32 = arith.constant 0 : i32
    %c0_i32_0 = arith.constant 0 : i32
    %c0_i32_1 = arith.constant 0 : i32
    %c0_i32_2 = arith.constant 0 : i32
    return %c0_i32, %c0_i32_0, %c0_i32_1 : i32, i32, i32
  }
  func.func @transform_3(%arg0: i32) -> (i32, i32, i32) {
    %c0_i32 = arith.constant 0 : i32
    %c0_i32_0 = arith.constant 0 : i32
    %c0_i32_1 = arith.constant 0 : i32
    %c0_i32_2 = arith.constant 0 : i32
    return %c0_i32, %c0_i32_0, %c0_i32_1 : i32, i32, i32
  }
  func.func @transform_4(%arg0: i32) -> (i32, i32, i32) {
    %c0_i32 = arith.constant 0 : i32
    %c0_i32_0 = arith.constant 0 : i32
    %c0_i32_1 = arith.constant 0 : i32
    %c0_i32_2 = arith.constant 0 : i32
    return %c0_i32, %c0_i32_0, %c0_i32_1 : i32, i32, i32
  }
  func.func @transform_5(%arg0: i32) -> (i32, i32) {
    %c0_i32 = arith.constant 0 : i32
    %c0_i32_0 = arith.constant 0 : i32
    %c0_i32_1 = arith.constant 0 : i32
    return %c0_i32, %c0_i32_0 : i32, i32
  }
  func.func @transform_6(%arg0: i32) -> (i32, i32) {
    %c0_i32 = arith.constant 0 : i32
    %c0_i32_0 = arith.constant 0 : i32
    %c0_i32_1 = arith.constant 0 : i32
    return %c0_i32, %c0_i32_0 : i32, i32
  }
  func.func @transform_7(%arg0: i32) -> (i32, i32, i32) {
    %c0_i32 = arith.constant 0 : i32
    %c0_i32_0 = arith.constant 0 : i32
    %c0_i32_1 = arith.constant 0 : i32
    return %arg0, %c0_i32, %c0_i32_0 : i32, i32, i32
  }
}

</mosaic_0001>

<bundles_post_ra>
// kernel: tpu_custom_call.1
= control target key start
LH: loop header
LB: loop body
LE: loop exit
PB: predicated region body
PF: predicated region fallthrough
CT: control target
= control target key end

     0   :  { %s1983_s0 = inlined_call_operand.hbm [shape: f32[4,8,32], index: 0, kind: input, shape index: {}]   ;;  %s1984_s1 = inlined_call_operand.hbm [shape: f32[4,8,32], index: 1, kind: input, shape index: {}]   ;;  %s1985_s2 = inlined_call_operand.hbm [shape: bf16[2,32,32], index: 2, kind: input, shape index: {}]   ;;  %s1986_s3 = inlined_call_operand.vmem [shape: bf16[2,8,32], index: 3, kind: input, shape index: {}]   ;;  %s1987_s4 = inlined_call_operand.hbm [shape: f32[2,32,32], index: 4, kind: input, shape index: {}]   ;;  %s1988_s5 = inlined_call_operand.vmem [shape: f32[4,32], index: 5, kind: input, shape index: {}]   ;;  %s1989_s6 = inlined_call_operand.vmem [shape: bf16[32,8], index: 6, kind: input, shape index: {}]   ;;  %s1990_s7 = inlined_call_operand.hbm [shape: f32[4,8,32], index: 7, kind: output, shape index: {}]  }
   0x1   :  { %1998 = sst [smem:[#allocation19_spill]] %s1983_s0 }
   0x2   :  { %1999 = sst [smem:[#allocation20_spill]] %s1985_s2 }
   0x3   :  { %2000 = sst [smem:[#allocation21_spill]] %s1987_s4 }
   0x4   :  { %12 = vsyncpa [#allocation3], 0 }
   0x5   :  { %14 = vsyncpa [#allocation3 + $0x1], 0 }
   0x6   :  { %15 = vsyncpa [#allocation6], 0 }
   0x7   :  { %17 = vsyncpa [#allocation6 + $0x1], 0 }
   0x8   :  { %18 = vsyncpa [#allocation9], 0 }
   0x9   :  { %19 = vsyncpa [#allocation4], 0 }
   0xa   :  { %21 = vsyncpa [#allocation4 + $0x1], 0  ;;  %s1617_s24 = smov 0   ;;  %s1619_s25 = smov 0  }
   0xb   :  { %s1621_s26 = smov 0   ;;  %s1623_s27 = smov 0  }
   0xc LB: > { %2001 = sst [smem:[#allocation16_spill]] %s1561_s26  ;;  %s1638_s28 = sadd.s32 4294967295, %s1565_s27   ;;  %s1565_s27 = sphi %s1623_s27, %s2015_s27   ;;  %s1561_s26 = sphi %s1621_s26, %s2017_s26   ;;  %s1557_s25 = sphi %s1619_s25, %s2019_s25   ;;  %s1553_s24 = sphi %s1617_s24, %s2018_s24  }
   0xd   : > { %s1206_s29 = sadd.s32 4294967294, %s1565_s27   ;;  %p47_p0 = scmp.ne.s32.totalorder %s1557_s25, %s1553_s24 }
   0xe   : > { %p48_p1 = scmp.eq.s32.totalorder %s1638_s28, 0  ;;  %p202_p2 = scmp.eq.s32.totalorder %s1638_s28, 1 }
   0xf   : > { %p208_p3 = scmp.eq.s32.totalorder %s1206_s29, 1  ;;  %p1207_p5 = scmp.ge.s32.totalorder %s1565_s27, 1 }
  0x10   : > { %p1647_p4 = por %p48_p1, %p47_p0  ;;  %p215_p7 = scmp.lt.s32.totalorder %s1565_s27, 3 }
  0x11   : > { %p1652_p6 = por %p208_p3, %p47_p0  ;;  %s2004_s2 = sld [smem:[#allocation20_spill]] }
  0x12   : > { %p1660_p8 = pnand %p1207_p5, %p215_p7  ;;  %s1567_s13 = smov [#allocation7]  }
  0x13   : > { %s228_s14 = sshll.u32 %s1567_s13, 4  ;;  %s2006_s4 = sld [smem:[#allocation21_spill]]  ;;  %s229_s14 = int_to_ptr.vmem [resolvable:$true] %s228_s14 }
  0x14   : > { %p1287_p9 = pneg %p1660_p8  ;;  %s1568_s18 = smov 64  }
  0x15   : > { %s1569_s19 = smov 4   ;;  %s1570_s20 = smov [#allocation8]  }
  0x16   : > { %p1288_p10 = pnand %p1287_p9, %p48_p1  ;;  %s245_s21 = sshll.u32 %s1570_s20, 4  ;;  %s246_s21 = int_to_ptr.vmem [resolvable:$true] %s245_s21 }
  0x17   : > { %s226_s11 = sshll.u32 %s2004_s2, 4  ;;  %s1991_s22 = smov 128   ;;  %s227_s11 = int_to_ptr.hbm [resolvable:$true] %s226_s11 }
  0x18   : > { %1290 = dma.hbm_to_vmem [thread:$0]  (!%p1288_p10), %s227_s11, 512, %s229_s14, [#allocation6], %s1568_s18, %s1568_s18, %s1569_s19  }
  0x19   : > { %s243_s17 = sshll.u32 %s2006_s4, 4  ;;  %s1993_s23 = smov 8   ;;  %s244_s17 = int_to_ptr.hbm [resolvable:$true] %s243_s17 }
  0x1a   : > { %1293 = dma.hbm_to_vmem [thread:$0]  (!%p1288_p10), %s244_s17, 1024, %s246_s21, [#allocation9], %s1991_s22, %s1991_s22, %s1993_s23  }
  0x1b   : > { %s1676_s29 = sadd.s32 1, %s1565_s27   ;;  %s34_s10 = sadd.s32 1, %s1561_s26 }
  0x1c   : > { %2007 = sst [smem:[#allocation17_spill]] %s1676_s29  ;;  %s31_s9 = ssub.s32 %s1565_s27, %s1676_s29 }
  0x1d   : > { %p32_p12 = scmp.eq.s32.totalorder %s31_s9, 0  ;;  %p41_p13 = scmp.ne.s32.totalorder %s1561_s26, %s1557_s25 }
  0x1e   : > { %p42_p0 = scmp.eq.s32.totalorder %s1565_s27, 0  ;;  %p1307_p7 = scmp.lt.s32.totalorder %s1565_s27, 2 }
  0x1f   : > { %s1685_s11 = scalar_select %p32_p12, %s1561_s26, %s34_s10  }
  0x20   : > { %p43_p3 = por %p42_p0, %p41_p13  ;;  %p1689_p5 = por %p202_p2, %p41_p13 }
  0x21   : > { %2008 = sst [smem:[#allocation18_spill]] %s1685_s11  ;;  %s265_s14 = sand.u32 1, %s1561_s26  }
  0x22   : > { %s1695_s15 = sshll.u32 %s265_s14, 4  ;;  %s1260_s16 = sshll.u32 %s1565_s27, 4 }
  0x23   : > { %s2010_s0 = sld [smem:[#allocation19_spill]]  ;;  %s269_s20 = scalar_lea.vmem [#allocation2], %s1695_s15 }
  0x24   : > { %s277_s21 = sshll.u32 %s269_s20, 4  ;;  %p1702_p9 = pnand %p1307_p7, %p43_p3  ;;  %s278_s21 = int_to_ptr.vmem [resolvable:$true] %s277_s21 }
  0x25   : > { %s296_s2 = scalar_lea.hbm %s1984_s1, %s1260_s16  ;;  %s266_s11 = scalar_lea.sflag [#allocation3], %s265_s14 }
  0x26   : > { %s297_s4 = sshll.u32 %s296_s2, 4  ;;  %p1431_p10 = pneg %p1702_p9  ;;  %s298_s4 = int_to_ptr.hbm [resolvable:$true] %s297_s4 }
  0x29   : > { %s274_s19 = scalar_lea.hbm %s2010_s0, %s1260_s16  ;;  %s1434_s20 = scalar_lea.hbm %s2010_s0, 32 }
  0x2a   : > { %s275_s9 = sshll.u32 %s274_s19, 4  ;;  %s276_s9 = int_to_ptr.hbm [resolvable:$true] %s275_s9 }
  0x2b   : > { %s1427_s26 = sshra.s32 %s276_s9, 4  ;;  %s1428_s26 = int_to_ptr.hbm [resolvable:$true] %s1427_s26 }
  0x2c   : > { %s1429_s17 = scalar_lea.hbm %s1428_s26, 16  ;;  %p1435_p0 = scmp.lt.s32.totalorder %s1428_s26, %s2010_s0 }
  0x2d   : > { %p1430_p2 = scmp.ne.s32.totalorder %s1428_s26, %s1429_s17  ;;  %p1436_p3 = scmp.lt.s32.totalorder %s1434_s20, %s1429_s17 }
  0x2f   : > { %p1432_p12 = pnand %p1431_p10, %p1430_p2  ;;  %p1437_p7 = por %p1436_p3, %p1435_p0 }
  0x31   : > { %p1433_p13 = pneg %p1432_p12 }
  0x33   : > { %p1438_p11 = pnand %p1437_p7, %p1433_p13 }
  0x35   : > { %1441 = shalt.err (!%p1438_p11)
}
  0x36   : > { %s2012_s2 = smov 8   ;;  %s2013_s14 = smov 128  }
  0x37   : > { %1297 = dma.hbm_to_vmem [thread:$0]  (!%p1702_p9), %s276_s9, 256, %s278_s21, %s266_s11, %s2013_s14, %s2013_s14, %s2012_s2  }
  0x38   : > { %s291_s16 = scalar_lea.vmem [#allocation5], %s1695_s15  ;;  %s287_s19 = sand.u32 1, %s1565_s27  }
  0x39   : > { %s299_s18 = sshll.u32 %s291_s16, 4  ;;  %s288_s22 = scalar_lea.sflag [#allocation6], %s287_s19  ;;  %s300_s18 = int_to_ptr.vmem [resolvable:$true] %s299_s18 }
  0x3a   : > { %s1457_s26 = sshra.s32 %s298_s4, 4  ;;  %s1464_s0 = scalar_lea.hbm %s1984_s1, 32  ;;  %s1458_s26 = int_to_ptr.hbm [resolvable:$true] %s1457_s26 }
  0x3b   : > { %s1459_s17 = scalar_lea.hbm %s1458_s26, 16  ;;  %p1465_p13 = scmp.lt.s32.totalorder %s1458_s26, %s1984_s1 }
  0x3c   : > { %p1460_p2 = scmp.ne.s32.totalorder %s1458_s26, %s1459_s17  ;;  %p1466_p0 = scmp.lt.s32.totalorder %s1464_s0, %s1459_s17 }
  0x3e   : > { %p1462_p11 = pnand %p1460_p2, %p1431_p10  ;;  %p1467_p3 = por %p1466_p0, %p1465_p13 }
  0x40   : > { %p1463_p12 = pneg %p1462_p11 }
  0x42   : > { %p1468_p7 = pnand %p1467_p3, %p1463_p12 }
  0x44   : > { %1471 = shalt.err (!%p1468_p7)
}
  0x45   : > { %1300 = dma.hbm_to_vmem [thread:$0]  (!%p1702_p9), %s298_s4, 256, %s300_s18, %s288_s22, %s2013_s14, %s2013_s14, %s2012_s2  }
  0x46   : > { %311 = sbr.rel (%p1660_p8) target bundleno = 742 (0x2e6), region = 48  ;;  %s1744_s15 = sand.u32 (!%p1660_p8), 1, %s1557_s25  }
  0x47   : > { %s1747_s29 = sshll.u32 (!%p1660_p8), %s1744_s15, 4  ;;  %s314_s0 = scalar_lea.sflag (!%p1660_p8), [#allocation3], %s1744_s15 }
  0x48   : > { %s317_s21 = scalar_lea.vmem (!%p1660_p8), [#allocation2], %s1747_s29 }
  0x4b   : > { %1532 = dma.done.wait (%p1647_p4), %s314_s0, 256  }
  0x4c   : > { %1534 = vsyncadd (%p1647_p4), %s314_s0, 4294967040  ;;  %s323_s4 = sand.u32 1, %s1638_s28   ;;  %s327_s9 = scalar_lea.vmem [#allocation5], %s1747_s29 }
  0x4d   : > { %s324_s12 = scalar_lea.sflag [#allocation6], %s323_s4 }
  0x4e   : > { %1536 = dma.done.wait (%p1647_p4), %s324_s12, 256  }
  0x4f   : > { %1538 = vsyncadd (%p1647_p4), %s324_s12, 4294967040 }
  0x50   : > { %1540 = dma.done.wait (%p48_p1), [#allocation6], 512  }
  0x51   : > { %1542 = vsyncadd (%p48_p1), [#allocation6], 4294966784 }
  0x52   : > { %1544 = dma.done.wait (%p48_p1), [#allocation9], 1024  }
  0x53   : > { %1546 = vsyncadd (%p48_p1), [#allocation9], 4294966272  ;;  %v1263_v0 = vld [vmem:[%s1989_s6 + $0x8] sm:$0xff]  ;;  %v1772_v1 = vld [vmem:[%s317_s21] sm:$0xff]  ;;  %vm401_vm0 = vcmask 261120   ;;  %vm423_vm1 = vcmask 64512  }
  0x54   : > { %v1262_v2 = vld [vmem:[%s1989_s6] sm:$0xff]  ;;  %v1777_v3 = vld [vmem:[%s317_s21 + $0x8] sm:$0xff]  ;;  %v382_v4 = vand.u32 2147483647, %v1772_v1  ;;  %411 = vmatpush.bf16.msra.mxu0 %v1263_v0  ;;  %vm484_vm2 = vcmask 1043456   ;;  %v1573_v24 = vmov 8.0  }
  0x55   : > { %v383_v5 = vand.u32 2147483647, %v1777_v3  ;;  %v1265_v17 = vld [vmem:[#allocation7 + $0x8] sm:$0xff]  ;;  %v1264_v18 = vld [vmem:[#allocation7] sm:$0xff]  ;;  %v1267_v27 = vld [vmem:[#allocation7 + $0x18] sm:$0xff]  ;;  %s1268_s12 = sshll.u32 %s1638_s28, 4 }
  0x56   : > { %523 = vmatpush.bf16.msra.mxu2 %v1265_v17  ;;  %v380_v19 = vld [vmem:[%s327_s9] sm:$0xff]  ;;  %v381_v20 = vld [vmem:[%s327_s9 + $0x8] sm:$0xff]  ;;  %s1087_s2 = scalar_lea.hbm %s1990_s7, %s1268_s12  ;;  %s373_s30 = scalar_lea.vmem [#allocation10], %s1747_s29 }
  0x57   : > { %v384_v6 = vpack.c.bf16 %v383_v5, %v382_v4  ;;  %v442_v21 = vpack.c.bf16 %v381_v20, %v380_v19  ;;  %v480_v22 = vld [vmem:[%s1986_s3] sm:$0xf]  ;;  %v1244_v23 = vld [vmem:[%s1986_s3 + $0x4] sm:$0xf]  ;;  %v1266_v29 = vld [vmem:[#allocation7 + $0x10] sm:$0xff]  ;;  %s1088_s14 = sshll.u32 %s373_s30, 4  ;;  %s1089_s14 = int_to_ptr.vmem [resolvable:$true] %s1088_s14 }
  0x58   : > { %412 = vmatpush.bf16.msra.mxu0 %v1262_v2  ;;  %v486_v25 = vsel %vm484_vm2, %v480_v22, 0  ;;  %v545_v26 = vsel %vm484_vm2, %v1244_v23, 0  ;;  %v618_v42 = vld [vmem:[#allocation8 + $0x38] sm:$0xff]  ;;  %v617_v44 = vld [vmem:[#allocation8 + $0x30] sm:$0xff]  ;;  %v616_v47 = vld [vmem:[#allocation8 + $0x28] sm:$0xff]  ;;  %s1090_s16 = sshll.u32 %s1087_s2, 4  ;;  %s1091_s16 = int_to_ptr.hbm [resolvable:$true] %s1090_s16 }
  0x59   : > { %495 = vmatpush.bf16.msra.mxu1 %v486_v25  ;;  %554 = vmatpush.bf16.msra.mxu3 %v545_v26  ;;  %v637_v43 = vand.u32 4294901760, %v618_v42  ;;  %v639_v46 = vand.u32 4294901760, %v617_v44  ;;  %v641_v51 = vand.u32 4294901760, %v616_v47  ;;  %v615_v52 = vld [vmem:[#allocation8 + $0x20] sm:$0xff]  ;;  %v613_v0 = vld [vmem:[#allocation8 + $0x18] sm:$0xff]  ;;  %s1076_s28 = scalar_lea.sflag [#allocation4], %s1744_s15 }
  0x5a   : > { %524 = vmatpush.bf16.msra.mxu2 %v1264_v18  ;;  %v643_v56 = vand.u32 4294901760, %v615_v52  ;;  %v610_v17 = vld [vmem:[#allocation8] sm:$0xff]  ;;  %s1501_s18 = sshra.s32 %s1091_s16, 4  ;;  %s1507_s26 = scalar_lea.hbm %s1990_s7, 32  ;;  %s1502_s18 = int_to_ptr.hbm [resolvable:$true] %s1501_s18 }
  0x5b   : > { %1231 = vmatmul.msk.bf16.vlgmr.msra.gmra.mxu0 %vm401_vm0, %v384_v6  ;;  %v1804_v45 = vsub.f32 %v618_v42, %v637_v43  ;;  %v1809_v50 = vsub.f32 %v617_v44, %v639_v46  ;;  %v1816_v55 = vsub.f32 %v616_v47, %v641_v51  ;;  %v1836_v6 = vand.u32 4294901760, %v613_v0  ;;  %s1503_s19 = scalar_lea.hbm %s1502_s18, 16  ;;  %p1508_p9 = scmp.lt.s32.totalorder %s1502_s18, %s1990_s7 }
  0x5c   : > { %v1823_v60 = vsub.f32 %v615_v52, %v643_v56  ;;  %v1860_v22 = vand.u32 4294901760, %v610_v17  ;;  %p1504_p1 = scmp.ne.s32.totalorder %s1502_s18, %s1503_s19  ;;  %p1509_p10 = scmp.lt.s32.totalorder %s1507_s26, %s1503_s19 }
  0x5d   : > { %1243 = vmatmul.msk.bf16.vlgmr.msra.gmra.mxu2 %vm401_vm0, %v442_v21  ;;  %579 = vmatpush.bf16.msrb.mxu1 %v1267_v27  ;;  %v676_v49 = vand.u32 4294901760, %v1804_v45  ;;  %v682_v54 = vand.u32 4294901760, %v1809_v50  ;;  %v688_v59 = vand.u32 4294901760, %v1816_v55 }
  0x5e   : > { %638 = vmatpush.msrb.mxu3 %v637_v43  ;;  %721 = vmatpush.msrb.mxu2 %v1804_v45  ;;  %v694_v63 = vand.u32 4294901760, %v1823_v60  ;;  %p1505_p4 = pnand %p1504_p1, %p1689_p5  ;;  %p1510_p2 = por %p1509_p10, %p1508_p9 }
  0x5f   : > { %v677_v53 = vsub.f32 %v1804_v45, %v676_v49  ;;  %v683_v58 = vsub.f32 %v1809_v50, %v682_v54  ;;  %v689_v62 = vsub.f32 %v1816_v55, %v688_v59 }
  0x60   : > { %640 = vmatpush.msrb.mxu3 %v639_v46  ;;  %724 = vmatpush.msrb.mxu2 %v1809_v50  ;;  %v695_v5 = vsub.f32 %v1823_v60, %v694_v63  ;;  %p1506_p8 = pneg %p1505_p4 }
  0x61   : > { %580 = vmatpush.bf16.msrb.mxu1 %v1266_v29  ;;  %v678_v57 = vand.u32 4294901760, %v677_v53  ;;  %v684_v61 = vand.u32 4294901760, %v683_v58  ;;  %v690_v4 = vand.u32 4294901760, %v689_v62  ;;  %v1353_v53 = vld [vmem:[%s1988_s5] ss:$0 sm:$0xff]  ;;  %v1574_v62 = vmov 0.0  }
  0x62   : > { %642 = vmatpush.msrb.mxu3 %v641_v51  ;;  %727 = vmatpush.msrb.mxu2 %v1816_v55  ;;  %p1511_p11 = pnand %p1510_p2, %p1506_p8 }
  0x63   : > { %679 = vmatpush.msrb.mxu0 %v678_v57 }
  0x64   : > { %644 = vmatpush.msrb.mxu3 %v643_v56  ;;  %730 = vmatpush.msrb.mxu2 %v1823_v60 }
  0x65   : > { %685 = vmatpush.msrb.mxu0 %v684_v61 }
  0x66   : > { %860 = vmatpush.msra.mxu2 %v1836_v6 }
  0x67   : > { %691 = vmatpush.msrb.mxu0 %v690_v4 }
  0xd8   : > { %v414_v7 = vpop.f32.mrf.mxu0 }
  0xd9   : > { %v415_v8 = vadd.f32 1.5258789e-05, %v414_v7  ;;  %v443_v7 = vlaneseq }
  0xdb   : > { %1357 = vlog2.f32 %v415_v8  ;;  %v612_v8 = vld [vmem:[#allocation8 + $0x10] sm:$0xff] }
  0xe0   : > { %v416_v9 = vpop.f32.mrf.mxu0  ;;  %v526_v23 = vpop.f32.mrf.mxu2 }
  0xe1   : > { %v1358_v10 = vpop.eup %1357  ;;  %v417_v11 = vadd.f32 1.5258789e-05, %v416_v9  ;;  %v696_v9 = vand.u32 4294901760, %v695_v5 }
  0xe2   : > { %v420_v12 = vmul.f32 0.6931472, %v1358_v10  ;;  %v1839_v10 = vsub.f32 %v613_v0, %v1836_v6 }
  0xe3   : > { %1359 = vlog2.f32 %v417_v11  ;;  %v1841_v11 = vand.u32 4294901760, %v612_v8  ;;  %697 = vmatpush.msrb.mxu0 %v696_v9 }
  0xe4   : > { %v424_v13 = vsel %vm423_vm1, %v420_v12, 0.0  ;;  %1361 = vrcp.f32 %v1573_v24 }
  0xe5   : > { %425 = vadd.xlane.f32.xlu0 %v424_v13  ;;  %v898_v13 = vand.u32 4294901760, %v1839_v10  ;;  %862 = vmatpush.msra.mxu2 %v1841_v11 }
  0xe6   : > { %825 = vmatpush.msra.mxu0 %v637_v43 }
  0xe7   : > { %v899_v19 = vsub.f32 %v1839_v10, %v898_v13 }
  0xe8   : > { %827 = vmatpush.msra.mxu0 %v639_v46 }
  0xe9   : > { %v1360_v14 = vpop.eup %1359  ;;  %v900_v25 = vand.u32 4294901760, %v899_v19  ;;  %v1355_v19 = vld [vmem:[%s1988_s5 + $0x2] ss:$0 sm:$0xff] }
  0xea   : > { %v422_v15 = vmul.f32 0.6931472, %v1360_v14  ;;  %v1362_v28 = vpop.eup %1361  ;;  %v1846_v14 = vsub.f32 %v612_v8, %v1841_v11  ;;  %829 = vmatpush.msra.mxu0 %v641_v51 }
  0xeb   : > { %v431_v30 = vmul.f32 8.0, %v1362_v28  ;;  %vm435_vm3 = vweird.f32 %v1362_v28 }
  0xec   : > { %v427_v16 = vsel %vm423_vm1, %v422_v15, 0.0  ;;  %v904_v20 = vand.u32 4294901760, %v1846_v14  ;;  %831 = vmatpush.msra.mxu0 %v643_v56 }
  0xed   : > { %428 = vadd.xlane.f32.xlu0 %v427_v16  ;;  %v432_v31 = vsub.f32 1.0, %v431_v30  ;;  %v1851_v16 = vshrl.u32 %v443_v7, 7 }
  0xee   : > { %v905_v26 = vsub.f32 %v1846_v14, %v904_v20 }
  0xef   : > { %v433_v32 = vmul.f32 %v1362_v28, %v432_v31  ;;  %v445_v29 = vadd.s32 8, %v1851_v16  ;;  %vm595_vm6 = vcmp.lt.s32.totalorder %v1851_v16, 1 }
  0xf0   : > { %v906_v30 = vand.u32 4294901760, %v905_v26 }
  0xf1   : > { %v434_v33 = vadd.f32 %v1362_v28, %v433_v32 }
  0xf3   : > { %v436_v35 = vsel %vm435_vm3, %v1362_v28, %v434_v33  ;;  %v1868_v28 = vsub.f32 %v610_v17, %v1860_v22  ;;  %v1354_v33 = vld [vmem:[%s1988_s5 + $0x1] ss:$0 sm:$0xff] }
  0xf5   : > { %v916_v32 = vand.u32 4294901760, %v1868_v28 }
 0x158   : > { %v426_v34 = vpop.xlane.xlu0 %425 }
 0x159   : > { %v1795_v36 = vmul.f32 %v436_v35, %v426_v34 }
 0x15b   : > { %v439_v39 = vsub.f32 %v420_v12, %v1795_v36  ;;  %v611_v12 = vld [vmem:[#allocation8 + $0x8] sm:$0xff]  ;;  %v589_v42 = vmul.f32 %v1354_v33, %v1795_v36  ;;  %v533_v7 = vmul.f32 %v1353_v53, %v1795_v36 }
 0x160   : > { %v429_v37 = vpop.xlane.xlu0 %428 }
 0x161   : > { %v1797_v38 = vmul.f32 %v436_v35, %v429_v37  ;;  %v917_v35 = vsub.f32 %v1868_v28, %v916_v32 }
 0x163   : > { %v440_v40 = vsub.f32 %v422_v15, %v1797_v38  ;;  %v1848_v15 = vand.u32 4294901760, %v611_v12  ;;  %v590_v52 = vmul.f32 %v1354_v33, %v1797_v38  ;;  %v534_v8 = vmul.f32 %v1353_v53, %v1797_v38 }
 0x165   : > { %v441_v41 = vpack.c.bf16 %v440_v40, %v439_v39  ;;  %864 = vmatpush.msra.mxu2 %v1848_v15  ;;  %v450_v39 = vand.u32 7, %v1851_v16  ;;  %v457_v40 = vand.u32 7, %v445_v29 }
 0x167   : > { %1234 = vmatmul.msk.bf16.vlgmr.msra.gmra.mxu1 %vm423_vm1, %v441_v41  ;;  %1245 = vmatmul.msk.bf16.vlgmr.msra.gmra.mxu3 %vm423_vm1, %v441_v41  ;;  %v918_v41 = vand.u32 4294901760, %v917_v35  ;;  %vm470_vm4 = vcmp.gt.s32.totalorder %v450_v39, 0  ;;  %vm471_vm5 = vcmp.gt.s32.totalorder %v457_v40, 0 }
 0x168   : > { %755 = vmatpush.msra.mxu1 %v637_v43  ;;  %1269 = vmatpush.msra.mxu3 %v637_v43  ;;  %v1891_v0 = vsel %vm470_vm4, 1.0, %v1574_v62  ;;  %v1893_v4 = vsel %vm471_vm5, 1.0, %v1574_v62 }
 0x169   : > { %866 = vmatpush.msra.mxu2 %v1860_v22 }
 0x16a   : > { %757 = vmatpush.msra.mxu1 %v639_v46  ;;  %1270 = vmatpush.msra.mxu3 %v639_v46  ;;  %v528_v46 = vpop.f32.mrf.mxu2 }
 0x16c   : > { %759 = vmatpush.msra.mxu1 %v641_v51  ;;  %1271 = vmatpush.msra.mxu3 %v641_v51 }
 0x16e   : > { %761 = vmatpush.msra.mxu1 %v643_v56  ;;  %1272 = vmatpush.msra.mxu3 %v643_v56 }
 0x177   : > { %1254 = vmatmul.msk.bf16.vlgmr.msrb.gmra.mxu1 %vm401_vm0, %v442_v21  ;;  %v1858_v21 = vsub.f32 %v611_v12, %v1848_v15 }
 0x178   : > { %901 = vmatpush.msrb.mxu1 %v900_v25 }
 0x179   : > { %v910_v27 = vand.u32 4294901760, %v1858_v21 }
 0x17a   : > { %907 = vmatpush.msrb.mxu1 %v906_v30 }
 0x17b   : > { %v911_v31 = vsub.f32 %v1858_v21, %v910_v27 }
 0x17d   : > { %v912_v34 = vand.u32 4294901760, %v911_v31 }
 0x17f   : > { %913 = vmatpush.msrb.mxu1 %v912_v34 }
 0x181   : > { %919 = vmatpush.msrb.mxu1 %v918_v41 }
 0x1e4   : > { %v1806_v48 = vpop.f32.mrf.mxu1 }
 0x1e5   : > { %v527_v57 = vadd.f32 %v526_v23, %v1806_v48 }
 0x1ea   : > { %v556_v18 = vpop.f32.mrf.mxu3 }
 0x1ec   : > { %v1831_v2 = vpop.f32.mrf.mxu1 }
 0x1ed   : > { %v529_v58 = vadd.f32 %v528_v46, %v1831_v2  ;;  %v535_v2 = vadd.f32 %v533_v7, %v527_v57 }
 0x1ef   : > { %v536_v12 = vadd.f32 %v534_v8, %v529_v58 }
 0x1f2   : > { %v558_v43 = vpop.f32.mrf.mxu3 }
 0x1f4   : > { %v582_v24 = vpop.f32.mrf.mxu1 }
 0x1f5   : > { %v583_v37 = vadd.f32 %v582_v24, %v556_v18 }
 0x1f7   : > { %v591_v47 = vadd.f32 %v589_v42, %v583_v37 }
 0x1f9   : > { %v593_v61 = vrot.slane %v591_v47, 7 }
 0x1fc   : > { %v584_v44 = vpop.f32.mrf.mxu1 }
 0x1fd   : > { %v585_v51 = vadd.f32 %v584_v44, %v558_v43 }
 0x1ff   : > { %v592_v56 = vadd.f32 %v590_v52, %v585_v51 }
 0x201   : > { %v594_v5 = vrot.slane %v592_v56, 7 }
 0x203   : > { %v596_v9 = vsel %vm595_vm6, %v593_v61, %v594_v5  ;;  %v597_v48 = vsel %vm595_vm6, %v594_v5, %v593_v61 }
 0x204   : > { %v598_v17 = vmul.f32 %v1891_v0, %v597_v48  ;;  %v599_v18 = vmul.f32 %v1893_v4, %v596_v9 }
 0x206   : > { %v600_v23 = vadd.f32 %v598_v17, %v535_v2  ;;  %v601_v36 = vadd.f32 %v599_v18, %v536_v12 }
 0x208   : > { %v604_v24 = vadd.f32 %v1355_v19, %v600_v23  ;;  %v605_v38 = vadd.f32 %v1355_v19, %v601_v36 }
 0x20a   : > { %v606_v25 = vmul.f32 0.2, %v604_v24  ;;  %v607_v26 = vmul.f32 0.2, %v605_v38 }
 0x20c   : > { %v608_v29 = vmax.f32 %v604_v24, %v606_v25  ;;  %v609_v30 = vmax.f32 %v605_v38, %v607_v26 }
 0x20e   : > { %v620_v31 = vsel %vm401_vm0, %v608_v29, 0  ;;  %v623_v33 = vsel %vm401_vm0, %v609_v30, 0 }
 0x20f   : > { %v645_v34 = vand.u32 4294901760, %v620_v31  ;;  %v653_v35 = vand.u32 4294901760, %v623_v33 }
 0x211   : > { %699 = vmatmul.f32.vlgmr.msrb.gmra.mxu0 %v645_v34  ;;  %v646_v37 = vsub.f32 %v620_v31, %v645_v34  ;;  %v654_v40 = vsub.f32 %v623_v33, %v653_v35 }
 0x212   : > { %977 = vmatpush.msrb.mxu0 %v1836_v6 }
 0x213   : > { %733 = vmatmul.f32.vlgmr.msrb.gmra.mxu2 %v646_v37  ;;  %v647_v39 = vand.u32 4294901760, %v646_v37  ;;  %v655_v43 = vand.u32 4294901760, %v654_v40 }
 0x214   : > { %979 = vmatpush.msrb.mxu0 %v1841_v11  ;;  %1012 = vmatpush.msrb.mxu2 %v898_v13 }
 0x215   : > { %765 = vmatmul.f32.vlgmr.msra.gmra.mxu1 %v647_v39  ;;  %v648_v41 = vsub.f32 %v646_v37, %v647_v39 }
 0x216   : > { %1047 = vmatpush.msra.mxu1 %v1836_v6  ;;  %981 = vmatpush.msrb.mxu0 %v1848_v15  ;;  %v656_v6 = vsub.f32 %v654_v40, %v655_v43 }
 0x217   : > { %v649_v42 = vand.u32 4294901760, %v648_v41  ;;  %1016 = vmatpush.msrb.mxu2 %v904_v20 }
 0x218   : > { %1049 = vmatpush.msra.mxu1 %v1841_v11  ;;  %983 = vmatpush.msrb.mxu0 %v1860_v22  ;;  %v657_v11 = vand.u32 4294901760, %v656_v6 }
 0x219   : > { %650 = vmatmul.f32.vlgmr.msrb.gmra.mxu3 %v649_v42  ;;  %703 = vmatmul.f32.gmra.mxu0 %v653_v35 }
 0x21a   : > { %790 = vmatpush.msrb.mxu3 %v676_v49  ;;  %1051 = vmatpush.msra.mxu1 %v1848_v15 }
 0x21b   : > { %738 = vmatmul.f32.gmra.mxu2 %v654_v40 }
 0x21c   : > { %794 = vmatpush.msrb.mxu3 %v682_v54  ;;  %1053 = vmatpush.msra.mxu1 %v1860_v22 }
 0x21d   : > { %921 = vmatmul.f32.vlgmr.msrb.gmra.mxu1 %v645_v34  ;;  %1020 = vmatpush.msrb.mxu2 %v910_v27 }
 0x21e   : > { %798 = vmatpush.msrb.mxu3 %v688_v59 }
 0x21f   : > { %1024 = vmatpush.msrb.mxu2 %v916_v32 }
 0x220   : > { %802 = vmatpush.msrb.mxu3 %v694_v63 }
 0x221   : > { %658 = vmatmul.f32.gmra.mxu3 %v657_v11  ;;  %833 = vmatmul.f32.vlgmr.msra.gmra.mxu0 %v645_v34 }
 0x223   : > { %872 = vmatmul.f32.vlgmr.msra.gmra.mxu2 %v649_v42 }
 0x225   : > { %925 = vmatmul.f32.gmra.mxu1 %v653_v35 }
 0x229   : > { %771 = vmatmul.f32.vlgmr.msra.gmra.mxu3 %v655_v43  ;;  %837 = vmatmul.f32.gmra.mxu0 %v653_v35 }
 0x22a   : > { %943 = vmatpush.msra.mxu3 %v1839_v10 }
 0x22b   : > { %880 = vmatmul.f32.gmra.mxu2 %v657_v11 }
 0x22c   : > { %946 = vmatpush.msra.mxu3 %v1846_v14 }
 0x22d   : > { %1055 = vmatmul.f32.vlgmr.msra.gmra.mxu1 %v645_v34 }
 0x22e   : > { %949 = vmatpush.msra.mxu3 %v1858_v21 }
 0x230   : > { %952 = vmatpush.msra.mxu3 %v1868_v28 }
 0x231   : > { %804 = vmatmul.f32.vlgmr.msrb.gmra.mxu3 %v645_v34  ;;  %987 = vmatmul.f32.vlgmr.msrb.gmra.mxu0 %v647_v39 }
 0x233   : > { %1026 = vmatmul.f32.vlgmr.msrb.gmra.mxu2 %v645_v34 }
 0x235   : > { %1059 = vmatmul.f32.gmra.mxu1 %v653_v35 }
 0x239   : > { %808 = vmatmul.f32.gmra.mxu3 %v653_v35  ;;  %993 = vmatmul.f32.gmra.mxu0 %v655_v43 }
 0x23b   : > { %1030 = vmatmul.f32.gmra.mxu2 %v653_v35 }
 0x241   : > { %955 = vmatmul.f32.vlgmr.msra.gmra.mxu3 %v646_v37 }
 0x249   : > { %960 = vmatmul.f32.gmra.mxu3 %v654_v40 }
 0x28e   : > { %v700_v45 = vpop.f32.mrf.mxu0 }
 0x292   : > { %v766_v60 = vpop.f32.mrf.mxu1 }
 0x296   : > { %v734_v50 = vpop.f32.mrf.mxu2  ;;  %v704_v55 = vpop.f32.mrf.mxu0 }
 0x29a   : > { %v922_v20 = vpop.f32.mrf.mxu1 }
 0x29c   : > { %v651_v49 = vpop.f32.mrf.mxu3 }
 0x29d   : > { %v701_v10 = vadd.f32 %v700_v45, %v651_v49 }
 0x29e   : > { %v739_v59 = vpop.f32.mrf.mxu2  ;;  %v834_v13 = vpop.f32.mrf.mxu0 }
 0x29f   : > { %v735_v15 = vadd.f32 %v734_v50, %v701_v10 }
 0x2a1   : > { %v767_v27 = vadd.f32 %v766_v60, %v735_v15 }
 0x2a2   : > { %v926_v56 = vpop.f32.mrf.mxu1 }
 0x2a4   : > { %v659_v54 = vpop.f32.mrf.mxu3 }
 0x2a5   : > { %v705_v22 = vadd.f32 %v704_v55, %v659_v54 }
 0x2a6   : > { %v873_v14 = vpop.f32.mrf.mxu2  ;;  %v838_v44 = vpop.f32.mrf.mxu0 }
 0x2a7   : > { %v740_v28 = vadd.f32 %v739_v59, %v705_v22 }
 0x2aa   : > { %v1056_v18 = vpop.f32.mrf.mxu1 }
 0x2ac   : > { %v772_v63 = vpop.f32.mrf.mxu3 }
 0x2ad   : > { %v773_v46 = vadd.f32 %v772_v63, %v740_v28 }
 0x2ae   : > { %v881_v47 = vpop.f32.mrf.mxu2  ;;  %v988_v7 = vpop.f32.mrf.mxu0 }
 0x2b2   : > { %v1060_v33 = vpop.f32.mrf.mxu1 }
 0x2b4   : > { %v805_v21 = vpop.f32.mrf.mxu3 }
 0x2b5   : > { %v806_v32 = vadd.f32 %v805_v21, %v767_v27 }
 0x2b6   : > { %v1027_v2 = vpop.f32.mrf.mxu2  ;;  %v994_v26 = vpop.f32.mrf.mxu0 }
 0x2b7   : > { %v835_v52 = vadd.f32 %v834_v13, %v806_v32 }
 0x2b9   : > { %v841_v58 = vrot.slane %v835_v52, 7 }
 0x2bc   : > { %v809_v51 = vpop.f32.mrf.mxu3 }
 0x2bd   : > { %v810_v53 = vadd.f32 %v809_v51, %v773_v46 }
 0x2bf   : > { %v839_v57 = vadd.f32 %v838_v44, %v810_v53 }
 0x2c1   : > { %v842_v61 = vrot.slane %v839_v57, 7 }
 0x2c3   : > { %v844_v62 = vsel %vm595_vm6, %v842_v61, %v841_v58  ;;  %v843_v5 = vsel %vm595_vm6, %v841_v58, %v842_v61 }
 0x2c4   : > { %v845_v8 = vmul.f32 %v1891_v0, %v844_v62  ;;  %v956_v9 = vpop.f32.mrf.mxu3  ;;  %v846_v48 = vmul.f32 %v1893_v4, %v843_v5  ;;  %v1356_v0 = vld [vmem:[%s1988_s5 + $0x3] ss:$0 sm:$0xff]  ;;  %v1031_v4 = vpop.f32.mrf.mxu2 }
 0x2c6   : > { %v874_v12 = vadd.f32 %v873_v14, %v845_v8  ;;  %v882_v17 = vadd.f32 %v881_v47, %v846_v48 }
 0x2c8   : > { %v923_v19 = vadd.f32 %v922_v20, %v874_v12  ;;  %v927_v36 = vadd.f32 %v926_v56, %v882_v17 }
 0x2ca   : > { %v957_v23 = vadd.f32 %v956_v9, %v923_v19 }
 0x2cc   : > { %v989_v24 = vadd.f32 %v988_v7, %v957_v23  ;;  %v961_v38 = vpop.f32.mrf.mxu3 }
 0x2cd   : > { %v962_v25 = vadd.f32 %v961_v38, %v927_v36 }
 0x2ce   : > { %v1028_v16 = vadd.f32 %v1027_v2, %v989_v24 }
 0x2cf   : > { %v995_v29 = vadd.f32 %v994_v26, %v962_v25 }
 0x2d0   : > { %v1057_v30 = vadd.f32 %v1056_v18, %v1028_v16 }
 0x2d1   : > { %v1032_v31 = vadd.f32 %v1031_v4, %v995_v29 }
 0x2d2   : > { %v1065_v34 = vadd.f32 %v1356_v0, %v1057_v30 }
 0x2d3   : > { %v1061_v35 = vadd.f32 %v1060_v33, %v1032_v31 }
 0x2d4   : > { %v1067_v37 = vmul.f32 1.442695, %v1065_v34 }
 0x2d5   : > { %v1066_v39 = vadd.f32 %v1356_v0, %v1061_v35 }
 0x2d6   : > { %1363 = vpow2.f32 %v1067_v37 }
 0x2d7   : > { %v1069_v40 = vmul.f32 1.442695, %v1066_v39 }
 0x2d9   : > { %1365 = vpow2.f32 %v1069_v40 }
 0x2dc   : > { %v1364_v41 = vpop.eup %1363 }
 0x2dd   : > { %v1071_v42 = vmul.f32 %v1364_v41, %v1772_v1 }
 0x2df   : > { %v1366_v43 = vpop.eup %1365  ;;  %1073 = vst.msk [vmem:[%s373_s30] sm:$0xff] %vm401_vm0, %v1071_v42 }
 0x2e0   : > { %v1072_v6 = vmul.f32 %v1366_v43, %v1777_v3 }
 0x2e2   : > { %1074 = vst.msk [vmem:[%s373_s30 + $0x8] sm:$0xff] %vm401_vm0, %v1072_v6 }
 0x2e3   : > { %1514 = shalt.err (!%p1511_p11)
}
 0x2e4   : > { %s1575_s15 = smov 128   ;;  %s1576_s23 = smov 8  }
 0x2e5   : > { %1285 = dma.vmem_to_hbm [thread:$0]  (%p1689_p5), %s1089_s14, 256, %s1091_s16, %s1076_s28, %s1575_s15, %s1575_s15, %s1576_s23  }
 0x2e6 PF: > { %s1105_s11 = sand.u32 1, %s1553_s24   ;;  %p2014_p12 = scmp.ge.s32.totalorder %s1565_s27, 2 }
 0x2e7   : > { %s1106_s0 = scalar_lea.sflag [#allocation4], %s1105_s11 }
 0x2e8   : > { %p1302_p13 = pnand %p2014_p12, %p1652_p6 }
 0x2ea   : > { %p1303_p0 = pneg %p1302_p13 }
 0x2ec   : > { %1548 = dma.done.wait (%p1303_p0), %s1106_s0, 256  }
 0x2ed   : > { %1550 = vsyncadd (%p1303_p0), %s1106_s0, 4294967040  ;;  %s2015_s27 = sld [smem:[#allocation17_spill]]  ;;  %s2018_s24 = smov %s1557_s25 }
 0x2ee   : > { %s2016_s21 = sld [smem:[#allocation16_spill]] }
 0x2ef   : > { %s2017_s26 = sld [smem:[#allocation18_spill]] }
 0x2f3   : > { %p24_p3 = scmp.ge.s32.totalorder %s2015_s27, 4  }
 0x2f4   : > { %s2019_s25 = smov %s2016_s21 }
 0x2f5   :  { %26 = sbr.rel (!%p24_p3) target bundleno = 12 (0xc), region = 117 }
 0x2fa   :  { %1112 = vsyncpa [#allocation3], 1 }
 0x2fb   :  { %1114 = vsyncpa [#allocation3 + $0x1], 1 }
 0x2fc   :  { %1115 = vsyncpa [#allocation6], 1 }
 0x2fd   :  { %1117 = vsyncpa [#allocation6 + $0x1], 1 }
 0x2fe   :  { %1118 = vsyncpa [#allocation9], 1 }
 0x2ff   :  { %1119 = vsyncpa [#allocation4], 1 }
 0x300   :  { %1121 = vsyncpa [#allocation4 + $0x1], 1 }

</bundles_post_ra>
